<compile_context>
chip_gen: v5e
topology: v5e:2x2
jax: 0.10.0
libtpu: 0.0.40
codegen_flags: <defaults>
</compile_context>

<pallas_src>
import math

import jax
import jax.numpy as jnp
from jax.experimental import pallas as pl
from jax.experimental.pallas import tpu as pltpu


# ----------------------------------------------------------------------------- kernel

def _pissa_linear_kernel(x_ref, wT_ref, b_ref, au_ref, vT_ref, o_ref, acc_ref):
    """One (i, j, k) grid step.

    x_ref:  (tm, tk)  compute dtype      wT_ref: (tk, tn) compute dtype
    b_ref:  (1, tn)   f32                au_ref: (tm, r_pad) f32  (precomputed x @ U.T)
    vT_ref: (r_pad, tn) compute dtype    o_ref:  (tm, tn) out dtype
    acc_ref: (tm, tn) f32 scratch
    """
    k = pl.program_id(2)

    @pl.when(k == 0)
    def _():
        acc_ref[...] = jnp.zeros_like(acc_ref)

    # Base linear partial product (K-tiled, f32 accumulation on the MXU).
    acc_ref[...] += jnp.dot(
        x_ref[...], wT_ref[...], preferred_element_type=jnp.float32
    )

    @pl.when(k == pl.num_programs(2) - 1)
    def _():
        # Adapter epilogue: (tm, r_pad) @ (r_pad, tn), once per (i, j) tile.
        # after_U is kept in f32 (no intermediate bf16 rounding); the small
        # vT tile is cast up, scaling is already folded into vT.
        adapter = jnp.dot(
            au_ref[...], vT_ref[...].astype(jnp.float32),
            preferred_element_type=jnp.float32,
        )
        o_ref[...] = (acc_ref[...] + b_ref[...] + adapter).astype(o_ref.dtype)


# ----------------------------------------------------------------------------- wrapper

def _round_up(a, b):
    return ((a + b - 1) // b) * b


def prepare_pissa_params(w_res, bias, u, v, scaling, *,
                         tn=1024, tk=1024, compute_dtype=jnp.bfloat16):
    """One-time (per parameter set) layout prep — hoisted out of the forward path.

    Pre-transposes, casts, zero-pads and folds `scaling` into V so every
    forward call only has to pad x.  Padding is exact (zeros on the contracted
    / output dims).  r is padded to 128 lanes so all adapter tiles are
    lane-dense.
    """
    out_f, in_f = w_res.shape
    r = u.shape[0]
    cdt = compute_dtype

    tn_e = min(tn, _round_up(out_f, 128))
    tk_e = min(tk, _round_up(in_f, 128))
    Kp = _round_up(in_f, tk_e)
    Np = _round_up(out_f, tn_e)
    r_pad = _round_up(r, 128)

    wT = jnp.pad(w_res.T.astype(cdt), ((0, Kp - in_f), (0, Np - out_f)))     # (Kp, Np)
    uT = jnp.pad(u.T.astype(cdt), ((0, Kp - in_f), (0, r_pad - r)))          # (Kp, r_pad)
    vT = jnp.pad((scaling * v).T.astype(cdt), ((0, r_pad - r), (0, Np - out_f)))  # (r_pad, Np)
    b2d = jnp.pad(bias.astype(jnp.float32), (0, Np - out_f)).reshape(1, Np)  # (1, Np) f32

    return {
        "wT": wT, "uT": uT, "vT": vT, "b2d": b2d,
        "in_features": in_f, "out_features": out_f,
        "r_pad": r_pad, "tn": tn_e, "tk": tk_e, "Kp": Kp, "Np": Np,
        "compute_dtype": cdt,
    }


def pissa_linear_forward(x, params, *, tm=512, vmem_limit_bytes=None):
    """x: (M, in).  Returns (M, out) = x @ W_res.T + b + scaling * (x @ U.T) @ V.T.

    `params` comes from prepare_pissa_params (cached across calls).
    Tiled (M, N, K) matmul with K-axis accumulation; arbitrary M / in / out
    sizes (x is zero-padded to tile multiples, result sliced back).
    """
    M, in_f = x.shape
    assert in_f == params["in_features"], "in_features mismatch"
    out_f = params["out_features"]
    out_dtype = x.dtype
    cdt = params["compute_dtype"]
    Kp, Np = params["Kp"], params["Np"]
    tn_e, tk_e = params["tn"], params["tk"]
    r_pad = params["r_pad"]

    # tm clamp: bf16 (and other sub-32-bit) x/out blocks need a sublane
    # multiple of 16; f32 needs 8.
    sub = 16 if jnp.dtype(cdt).itemsize < 4 else 8
    tm_e = min(tm, _round_up(M, sub))
    Mp = _round_up(M, tm_e)

    # Per-call input prep: pad x only (weights are already prepped).
    xc = jnp.pad(x.astype(cdt), ((0, Mp - M), (0, Kp - in_f)))               # (Mp, Kp)

    # One-shot after_U prepass: tiny (M, r) matmul, kept in f32 so the kernel
    # epilogue sees un-requantized adapter activations.  Scaling lives in vT.
    after_u = jnp.dot(xc, params["uT"], preferred_element_type=jnp.float32)  # (Mp, r_pad) f32

    grid = (Mp // tm_e, Np // tn_e, Kp // tk_e)

    compiler_params = pltpu.CompilerParams(
        dimension_semantics=("parallel", "parallel", "arbitrary"),
        vmem_limit_bytes=vmem_limit_bytes,
    )

    out_padded = pl.pallas_call(
        _pissa_linear_kernel,
        out_shape=jax.ShapeDtypeStruct((Mp, Np), out_dtype),
        grid_spec=pltpu.PrefetchScalarGridSpec(
            num_scalar_prefetch=0,
            grid=grid,
            in_specs=[
                pl.BlockSpec((tm_e, tk_e), lambda i, j, k: (i, k)),    # x tile
                pl.BlockSpec((tk_e, tn_e), lambda i, j, k: (k, j)),    # W_res.T tile
                pl.BlockSpec((1, tn_e),    lambda i, j, k: (0, j)),    # bias tile (f32)
                pl.BlockSpec((tm_e, r_pad), lambda i, j, k: (i, 0)),   # after_U tile (f32)
                pl.BlockSpec((r_pad, tn_e), lambda i, j, k: (0, j)),   # (scaling*V).T tile
            ],
            out_specs=pl.BlockSpec((tm_e, tn_e), lambda i, j, k: (i, j)),
            scratch_shapes=[
                pltpu.VMEM((tm_e, tn_e), jnp.float32),                 # base accumulator
            ],
        ),
        compiler_params=compiler_params,
    )(xc, params["wT"], params["b2d"], after_u, params["vT"])

    return out_padded[:M, :out_f]


# ----------------------------------------------------------------------------- PiSSA init glue

def init_pissa_params(key, in_features, out_features, r, pissa_alpha):
    """Deterministic parameter setup mirroring Linear.update_layer + reset_pissa_parameters
    (singular_value=None, fsvd=None, use_rspissa=False, init_pissa_weights=True)."""
    kw, kb = jax.random.split(key)
    # base nn.Linear weight/bias (PyTorch default uniform init, done deterministically here)
    bound = 1.0 / math.sqrt(in_features)
    w = jax.random.uniform(kw, (out_features, in_features), jnp.float32, -bound, bound)
    b = jax.random.uniform(kb, (out_features,), jnp.float32, -bound, bound)

    scaling = pissa_alpha / r

    # reset_pissa_parameters: full SVD of W, take top-r components.
    U_full, S_full, Vh_full = jnp.linalg.svd(w, full_matrices=False)
    Ur = U_full[:, :r]          # (out, r)   -> pissa_V direction
    Sr = S_full[:r]             # (r,)
    Vhr = Vh_full[:r, :]        # (r, in)    -> pissa_U direction

    sqrt_s = jnp.sqrt(Sr)
    u_weight = sqrt_s[:, None] * Vhr          # pissa_U.weight  (r, in)
    v_weight = Ur * sqrt_s[None, :]           # pissa_V.weight  (out, r)
    # residual base weight: W - (Ur * Sr) @ Vhr * scaling
    w_res = w - (Ur * Sr[None, :]) @ Vhr * scaling

    return w_res.astype(jnp.float32), b, u_weight, v_weight, scaling


# ----------------------------------------------------------------------------- test

if __name__ == "__main__":
    batch, seq, in_features, out_features, r, pissa_alpha = 2, 8, 32, 48, 8, 8

    key = jax.random.PRNGKey(0)
    kx, kp = jax.random.split(key)
    x = jax.random.normal(kx, (batch, seq, in_features), jnp.float32)

    w_res, bias, u_w, v_w, scaling = init_pissa_params(
        kp, in_features, out_features, r, pissa_alpha
    )

    x2d = x.reshape(batch * seq, in_features)

    # --- f32 compute: tight check against the module's forward semantics ---
    params_f32 = prepare_pissa_params(
        w_res, bias, u_w, v_w, scaling, compute_dtype=jnp.float32
    )
    out2d = pissa_linear_forward(x2d, params_f32)
    out = out2d.reshape(batch, seq, out_features)
    jax.block_until_ready(out)

    ref = (x2d @ w_res.T + bias[None, :]
           + scaling * ((x2d @ u_w.T) @ v_w.T)).reshape(batch, seq, out_features)
    assert jnp.allclose(out, ref, atol=1e-4, rtol=1e-4), "f32 mismatch vs reference"

    # --- default bf16 compute path (MXU bf16 peak, f32 accumulation): loose check ---
    params_bf16 = prepare_pissa_params(w_res, bias, u_w, v_w, scaling)  # bf16 default
    out2d_bf = pissa_linear_forward(x2d, params_bf16)
    out_bf = out2d_bf.reshape(batch, seq, out_features)
    jax.block_until_ready(out_bf)

    xb = x2d.astype(jnp.bfloat16).astype(jnp.float32)
    wb = w_res.astype(jnp.bfloat16).astype(jnp.float32)
    ub = u_w.astype(jnp.bfloat16).astype(jnp.float32)
    vb = (scaling * v_w).astype(jnp.bfloat16).astype(jnp.float32)
    ref_bf = (xb @ wb.T + bias[None, :]
              + (xb @ ub.T) @ vb.T).reshape(batch, seq, out_features)
    assert jnp.allclose(out_bf, ref_bf, atol=5e-2, rtol=5e-2), "bf16 mismatch vs reference"

    print("KERNEL_OK")
</pallas_src>

<mosaic_0001>
module attributes {stable_mosaic.version = 11 : i64} {
  func.func @_pissa_linear_kernel(%arg0: i32, %arg1: i32, %arg2: i32, %arg3: memref<16x128xf32, #tpu.memory_space<vmem>>, %arg4: memref<128x128xf32, #tpu.memory_space<vmem>>, %arg5: memref<1x128xf32, #tpu.memory_space<vmem>>, %arg6: memref<16x128xf32, #tpu.memory_space<vmem>>, %arg7: memref<128x128xf32, #tpu.memory_space<vmem>>, %arg8: memref<16x128xf32, #tpu.memory_space<vmem>>, %arg9: memref<16x128xf32, #tpu.memory_space<vmem>>) attributes {dimension_semantics = [#tpu.dimension_semantics<parallel>, #tpu.dimension_semantics<parallel>, #tpu.dimension_semantics<arbitrary>], iteration_bounds = array<i64: 1, 1, 1>, scalar_prefetch = 0 : i64, scratch_operands = 1 : i64, tpu.core_type = #tpu.core_type<tc>, window_params = [{transform_indices = @transform_0, window_bounds = array<i64: 16, 128>}, {transform_indices = @transform_1, window_bounds = array<i64: 128, 128>}, {transform_indices = @transform_2, window_bounds = array<i64: 1, 128>}, {transform_indices = @transform_3, window_bounds = array<i64: 16, 128>}, {transform_indices = @transform_4, window_bounds = array<i64: 128, 128>}, {transform_indices = @transform_5, window_bounds = array<i64: 16, 128>}]} {
    %c0_i32 = arith.constant 0 : i32
    %0 = arith.cmpi eq, %arg2, %c0_i32 : i32
    %1 = arith.extui %0 : i1 to i32
    %c0_i32_0 = arith.constant 0 : i32
    %2 = arith.cmpi ne, %1, %c0_i32_0 : i32
    scf.if %2 {
      %cst_10 = arith.constant 0.000000e+00 : f32
      %12 = vector.broadcast %cst_10 : f32 to vector<16x128xf32>
      %c0_11 = arith.constant 0 : index
      %c0_12 = arith.constant 0 : index
      %13 = vector.load %arg9[%c0_11, %c0_12] : memref<16x128xf32, #tpu.memory_space<vmem>>, vector<16x128xf32>
      tpu.vector_store %arg9[%c0_11, %c0_12], %12 {strides = array<i32>} : memref<16x128xf32, #tpu.memory_space<vmem>>, vector<16x128xf32>,
    } else {
    }
    %c0 = arith.constant 0 : index
    %c0_1 = arith.constant 0 : index
    %3 = vector.load %arg9[%c0, %c0_1] : memref<16x128xf32, #tpu.memory_space<vmem>>, vector<16x128xf32>
    %c0_2 = arith.constant 0 : index
    %c0_3 = arith.constant 0 : index
    %4 = vector.load %arg3[%c0_2, %c0_3] : memref<16x128xf32, #tpu.memory_space<vmem>>, vector<16x128xf32>
    %c0_4 = arith.constant 0 : index
    %c0_5 = arith.constant 0 : index
    %5 = vector.load %arg4[%c0_4, %c0_5] : memref<128x128xf32, #tpu.memory_space<vmem>>, vector<128x128xf32>
    %cst = arith.constant dense<0.000000e+00> : vector<16x128xf32>
    %6 = tpu.matmul %4, %5, %cst {dimension_numbers = #tpu.dot_dimension_numbers<[1], [0], [0], [1], [0, 0, 1, 1], [], []>} : vector<16x128xf32>, vector<128x128xf32>, vector<16x128xf32> -> vector<16x128xf32>
    %7 = arith.addf %3, %6 : vector<16x128xf32>
    %c0_6 = arith.constant 0 : index
    %c0_7 = arith.constant 0 : index
    %8 = vector.load %arg9[%c0_6, %c0_7] : memref<16x128xf32, #tpu.memory_space<vmem>>, vector<16x128xf32>
    tpu.vector_store %arg9[%c0_6, %c0_7], %7 {strides = array<i32>} : memref<16x128xf32, #tpu.memory_space<vmem>>, vector<16x128xf32>,
    %c0_i32_8 = arith.constant 0 : i32
    %9 = arith.cmpi eq, %arg2, %c0_i32_8 : i32
    %10 = arith.extui %9 : i1 to i32
    %c0_i32_9 = arith.constant 0 : i32
    %11 = arith.cmpi ne, %10, %c0_i32_9 : i32
    scf.if %11 {
      %c0_10 = arith.constant 0 : index
      %c0_11 = arith.constant 0 : index
      %12 = vector.load %arg6[%c0_10, %c0_11] : memref<16x128xf32, #tpu.memory_space<vmem>>, vector<16x128xf32>
      %c0_12 = arith.constant 0 : index
      %c0_13 = arith.constant 0 : index
      %13 = vector.load %arg7[%c0_12, %c0_13] : memref<128x128xf32, #tpu.memory_space<vmem>>, vector<128x128xf32>
      %cst_14 = arith.constant dense<0.000000e+00> : vector<16x128xf32>
      %14 = tpu.matmul %12, %13, %cst_14 {dimension_numbers = #tpu.dot_dimension_numbers<[1], [0], [0], [1], [0, 0, 1, 1], [], []>} : vector<16x128xf32>, vector<128x128xf32>, vector<16x128xf32> -> vector<16x128xf32>
      %c0_15 = arith.constant 0 : index
      %c0_16 = arith.constant 0 : index
      %15 = vector.load %arg9[%c0_15, %c0_16] : memref<16x128xf32, #tpu.memory_space<vmem>>, vector<16x128xf32>
      %c0_17 = arith.constant 0 : index
      %c0_18 = arith.constant 0 : index
      %16 = vector.load %arg5[%c0_17, %c0_18] : memref<1x128xf32, #tpu.memory_space<vmem>>, vector<1x128xf32>
      %17 = vector.broadcast %16 : vector<1x128xf32> to vector<16x128xf32>
      %18 = arith.addf %15, %17 : vector<16x128xf32>
      %19 = arith.addf %18, %14 : vector<16x128xf32>
      %c0_19 = arith.constant 0 : index
      %c0_20 = arith.constant 0 : index
      %20 = vector.load %arg8[%c0_19, %c0_20] : memref<16x128xf32, #tpu.memory_space<vmem>>, vector<16x128xf32>
      tpu.vector_store %arg8[%c0_19, %c0_20], %19 {strides = array<i32>} : memref<16x128xf32, #tpu.memory_space<vmem>>, vector<16x128xf32>,
    } else {
    }
    return
  }
  func.func @transform_0(%arg0: i32, %arg1: i32, %arg2: i32) -> (i32, i32) {
    %c0_i32 = arith.constant 0 : i32
    return %arg0, %arg2 : i32, i32
  }
  func.func @transform_1(%arg0: i32, %arg1: i32, %arg2: i32) -> (i32, i32) {
    %c0_i32 = arith.constant 0 : i32
    return %arg2, %arg1 : i32, i32
  }
  func.func @transform_2(%arg0: i32, %arg1: i32, %arg2: i32) -> (i32, i32) {
    %c0_i32 = arith.constant 0 : i32
    %c0_i32_0 = arith.constant 0 : i32
    return %c0_i32, %arg1 : i32, i32
  }
  func.func @transform_3(%arg0: i32, %arg1: i32, %arg2: i32) -> (i32, i32) {
    %c0_i32 = arith.constant 0 : i32
    %c0_i32_0 = arith.constant 0 : i32
    return %arg0, %c0_i32 : i32, i32
  }
  func.func @transform_4(%arg0: i32, %arg1: i32, %arg2: i32) -> (i32, i32) {
    %c0_i32 = arith.constant 0 : i32
    %c0_i32_0 = arith.constant 0 : i32
    return %c0_i32, %arg1 : i32, i32
  }
  func.func @transform_5(%arg0: i32, %arg1: i32, %arg2: i32) -> (i32, i32) {
    %c0_i32 = arith.constant 0 : i32
    return %arg0, %arg1 : i32, i32
  }
}

</mosaic_0001>

<bundles_post_ra>
// kernel: tpu_custom_call.1
= control target key start
LH: loop header
LB: loop body
LE: loop exit
PB: predicated region body
PF: predicated region fallthrough
CT: control target
= control target key end

     0   :  { %10 = vsyncpa [#allocation4], 0  ;;  %s452_s0 = inlined_call_operand.hbm [shape: f32[16,128], index: 0, kind: input, shape index: {}]   ;;  %s453_s1 = inlined_call_operand.hbm [shape: f32[128,128], index: 1, kind: input, shape index: {}]   ;;  %s454_s2 = inlined_call_operand.vmem [shape: f32[1,128], index: 2, kind: input, shape index: {}]   ;;  %s455_s3 = inlined_call_operand.hbm [shape: f32[16,128], index: 3, kind: input, shape index: {}]   ;;  %s456_s4 = inlined_call_operand.hbm [shape: f32[128,128], index: 4, kind: input, shape index: {}]   ;;  %s457_s5 = inlined_call_operand.hbm [shape: f32[16,128], index: 5, kind: output, shape index: {}]  }
   0x1   :  { %11 = vsyncpa [#allocation7], 0 }
   0x2   :  { %12 = vsyncpa [#allocation10], 0 }
   0x3   :  { %13 = vsyncpa [#allocation5], 0  ;;  %s31_s20 = sshll.u32 %s453_s1, 4  ;;  %s382_s21 = smov [#allocation6]   ;;  %s32_s20 = int_to_ptr.hbm [resolvable:$true] %s31_s20 }
   0x4   :  { %s33_s22 = sshll.u32 %s382_s21, 4  ;;  %s18_s25 = sshll.u32 %s452_s0, 4  ;;  %s34_s22 = int_to_ptr.vmem [resolvable:$true] %s33_s22  ;;  %s19_s25 = int_to_ptr.hbm [resolvable:$true] %s18_s25 }
   0x5   :  { %s383_s26 = smov 128   ;;  %s384_s27 = smov 8  }
   0x6   :  { %39 = dma.hbm_to_vmem [thread:$0]  %s32_s20, 2048, %s34_s22, [#allocation7], %s383_s26, %s383_s26, %s384_s27  }
   0x7   :  { %s385_s28 = smov [#allocation3]   ;;  %s46_s1 = sshll.u32 %s455_s3, 4  ;;  %s47_s1 = int_to_ptr.hbm [resolvable:$true] %s46_s1 }
   0x8   :  { %s20_s29 = sshll.u32 %s385_s28, 4  ;;  %s59_s8 = sshll.u32 %s456_s4, 4  ;;  %s21_s29 = int_to_ptr.vmem [resolvable:$true] %s20_s29  ;;  %s60_s8 = int_to_ptr.hbm [resolvable:$true] %s59_s8 }
   0x9   :  { %26 = dma.hbm_to_vmem [thread:$0]  %s19_s25, 256, %s21_s29, [#allocation4], %s383_s26, %s383_s26, %s384_s27  }
   0xa   :  { %s386_s9 = smov [#allocation8]   ;;  %s387_s11 = smov [#allocation9]  }
   0xb   :  { %s48_s10 = sshll.u32 %s386_s9, 4  ;;  %s61_s3 = sshll.u32 %s387_s11, 4  ;;  %s49_s10 = int_to_ptr.vmem [resolvable:$true] %s48_s10  ;;  %s62_s3 = int_to_ptr.vmem [resolvable:$true] %s61_s3 }
   0xc   :  { %54 = dma.hbm_to_vmem [thread:$0]  %s47_s1, 256, %s49_s10, [#allocation7], %s383_s26, %s383_s26, %s384_s27  }
   0xd   :  { %67 = dma.hbm_to_vmem [thread:$0]  %s60_s8, 2048, %s62_s3, [#allocation10], %s383_s26, %s383_s26, %s384_s27  }
   0xe   :  { %374 = dma.done.wait [#allocation4], 256  }
   0xf   :  { %375 = vsyncadd [#allocation4], 4294967040 }
  0x10   :  { %376 = dma.done.wait [#allocation7], 2304  }
  0x11   :  { %377 = vsyncadd [#allocation7], 4294964992 }
  0x12   :  { %378 = dma.done.wait [#allocation10], 2048  }
  0x13   :  { %379 = vsyncadd [#allocation10], 4294965248  ;;  %v109_v0 = vld [vmem:[#allocation6 + $0x78] sm:$0xff]  ;;  %v108_v1 = vld [vmem:[#allocation6 + $0x70] sm:$0xff]  ;;  %s388_s13 = smov [#allocation11]   ;;  %s199_s17 = sshll.u32 %s457_s5, 4  ;;  %s200_s17 = int_to_ptr.hbm [resolvable:$true] %s199_s17 }
  0x14   :  { %v157_v2 = vld [vmem:[#allocation9 + $0x78] sm:$0xff]  ;;  %214 = vmatpush.msra.mxu2 %v109_v0  ;;  %v156_v3 = vld [vmem:[#allocation9 + $0x70] sm:$0xff]  ;;  %110 = vmatpush.msra.mxu0 %v109_v0  ;;  %v155_v5 = vld [vmem:[#allocation9 + $0x68] sm:$0xff]  ;;  %s197_s14 = sshll.u32 %s388_s13, 4  ;;  %s198_s14 = int_to_ptr.vmem [resolvable:$true] %s197_s14 }
  0x15   :  { %230 = vmatpush.msra.mxu3 %v157_v2  ;;  %v107_v4 = vld [vmem:[#allocation6 + $0x68] sm:$0xff]  ;;  %158 = vmatpush.msra.mxu1 %v157_v2  ;;  %v106_v6 = vld [vmem:[#allocation6 + $0x60] sm:$0xff]  ;;  %v154_v7 = vld [vmem:[#allocation9 + $0x60] sm:$0xff] }
  0x16   :  { %215 = vmatpush.msra.mxu2 %v108_v1  ;;  %111 = vmatpush.msra.mxu0 %v108_v1  ;;  %v105_v8 = vld [vmem:[#allocation6 + $0x58] sm:$0xff]  ;;  %v153_v9 = vld [vmem:[#allocation9 + $0x58] sm:$0xff]  ;;  %v104_v10 = vld [vmem:[#allocation6 + $0x50] sm:$0xff] }
  0x17   :  { %231 = vmatpush.msra.mxu3 %v156_v3  ;;  %159 = vmatpush.msra.mxu1 %v156_v3  ;;  %v152_v11 = vld [vmem:[#allocation9 + $0x50] sm:$0xff]  ;;  %v103_v12 = vld [vmem:[#allocation6 + $0x48] sm:$0xff]  ;;  %v151_v13 = vld [vmem:[#allocation9 + $0x48] sm:$0xff] }
  0x18   :  { %216 = vmatpush.msra.mxu2 %v107_v4  ;;  %112 = vmatpush.msra.mxu0 %v107_v4  ;;  %v102_v14 = vld [vmem:[#allocation6 + $0x40] sm:$0xff]  ;;  %v150_v15 = vld [vmem:[#allocation9 + $0x40] sm:$0xff]  ;;  %v101_v16 = vld [vmem:[#allocation6 + $0x38] sm:$0xff] }
  0x19   :  { %232 = vmatpush.msra.mxu3 %v155_v5  ;;  %160 = vmatpush.msra.mxu1 %v155_v5  ;;  %v149_v17 = vld [vmem:[#allocation9 + $0x38] sm:$0xff]  ;;  %v100_v18 = vld [vmem:[#allocation6 + $0x30] sm:$0xff]  ;;  %v148_v19 = vld [vmem:[#allocation9 + $0x30] sm:$0xff] }
  0x1a   :  { %217 = vmatpush.msra.mxu2 %v106_v6  ;;  %113 = vmatpush.msra.mxu0 %v106_v6  ;;  %v99_v20 = vld [vmem:[#allocation6 + $0x28] sm:$0xff]  ;;  %v147_v21 = vld [vmem:[#allocation9 + $0x28] sm:$0xff]  ;;  %v98_v22 = vld [vmem:[#allocation6 + $0x20] sm:$0xff] }
  0x1b   :  { %233 = vmatpush.msra.mxu3 %v154_v7  ;;  %161 = vmatpush.msra.mxu1 %v154_v7  ;;  %v146_v23 = vld [vmem:[#allocation9 + $0x20] sm:$0xff]  ;;  %v97_v24 = vld [vmem:[#allocation6 + $0x18] sm:$0xff]  ;;  %v145_v25 = vld [vmem:[#allocation9 + $0x18] sm:$0xff] }
  0x1c   :  { %218 = vmatpush.msra.mxu2 %v105_v8  ;;  %114 = vmatpush.msra.mxu0 %v105_v8  ;;  %v96_v26 = vld [vmem:[#allocation6 + $0x10] sm:$0xff]  ;;  %v144_v27 = vld [vmem:[#allocation9 + $0x10] sm:$0xff]  ;;  %v95_v28 = vld [vmem:[#allocation6 + $0x8] sm:$0xff] }
  0x1d   :  { %234 = vmatpush.msra.mxu3 %v153_v9  ;;  %162 = vmatpush.msra.mxu1 %v153_v9  ;;  %v143_v29 = vld [vmem:[#allocation9 + $0x8] sm:$0xff]  ;;  %v94_v30 = vld [vmem:[#allocation6] sm:$0xff]  ;;  %v142_v31 = vld [vmem:[#allocation9] sm:$0xff] }
  0x1e   :  { %219 = vmatpush.msra.mxu2 %v104_v10  ;;  %115 = vmatpush.msra.mxu0 %v104_v10  ;;  %v93_v32 = vld [vmem:[#allocation3 + $0x8] sm:$0xff]  ;;  %v141_v33 = vld [vmem:[#allocation8 + $0x8] sm:$0xff]  ;;  %v92_v34 = vld [vmem:[#allocation3] sm:$0xff] }
  0x1f   :  { %235 = vmatpush.msra.mxu3 %v152_v11  ;;  %163 = vmatpush.msra.mxu1 %v152_v11  ;;  %v140_v35 = vld [vmem:[#allocation8] sm:$0xff]  ;;  %v253_v36 = vld [vmem:[%s454_s2] ss:$0 sm:$0xff] }
  0x20   :  { %220 = vmatpush.msra.mxu2 %v103_v12  ;;  %116 = vmatpush.msra.mxu0 %v103_v12 }
  0x21   :  { %236 = vmatpush.msra.mxu3 %v151_v13  ;;  %164 = vmatpush.msra.mxu1 %v151_v13 }
  0x22   :  { %221 = vmatpush.msra.mxu2 %v102_v14  ;;  %117 = vmatpush.msra.mxu0 %v102_v14 }
  0x23   :  { %237 = vmatpush.msra.mxu3 %v150_v15  ;;  %165 = vmatpush.msra.mxu1 %v150_v15 }
  0x24   :  { %222 = vmatpush.msra.mxu2 %v101_v16  ;;  %118 = vmatpush.msra.mxu0 %v101_v16 }
  0x25   :  { %238 = vmatpush.msra.mxu3 %v149_v17  ;;  %166 = vmatpush.msra.mxu1 %v149_v17 }
  0x26   :  { %223 = vmatpush.msra.mxu2 %v100_v18  ;;  %119 = vmatpush.msra.mxu0 %v100_v18 }
  0x27   :  { %239 = vmatpush.msra.mxu3 %v148_v19  ;;  %167 = vmatpush.msra.mxu1 %v148_v19 }
  0x28   :  { %224 = vmatpush.msra.mxu2 %v99_v20  ;;  %120 = vmatpush.msra.mxu0 %v99_v20 }
  0x29   :  { %240 = vmatpush.msra.mxu3 %v147_v21  ;;  %168 = vmatpush.msra.mxu1 %v147_v21 }
  0x2a   :  { %225 = vmatpush.msra.mxu2 %v98_v22  ;;  %121 = vmatpush.msra.mxu0 %v98_v22 }
  0x2b   :  { %241 = vmatpush.msra.mxu3 %v146_v23  ;;  %169 = vmatpush.msra.mxu1 %v146_v23 }
  0x2c   :  { %226 = vmatpush.msra.mxu2 %v97_v24  ;;  %122 = vmatpush.msra.mxu0 %v97_v24 }
  0x2d   :  { %242 = vmatpush.msra.mxu3 %v145_v25  ;;  %170 = vmatpush.msra.mxu1 %v145_v25 }
  0x2e   :  { %227 = vmatpush.msra.mxu2 %v96_v26  ;;  %123 = vmatpush.msra.mxu0 %v96_v26 }
  0x2f   :  { %243 = vmatpush.msra.mxu3 %v144_v27  ;;  %171 = vmatpush.msra.mxu1 %v144_v27 }
  0x30   :  { %228 = vmatpush.msra.mxu2 %v95_v28  ;;  %124 = vmatpush.msra.mxu0 %v95_v28 }
  0x31   :  { %244 = vmatpush.msra.mxu3 %v143_v29  ;;  %172 = vmatpush.msra.mxu1 %v143_v29 }
  0x32   :  { %229 = vmatpush.msra.mxu2 %v94_v30  ;;  %125 = vmatpush.msra.mxu0 %v94_v30 }
  0x33   :  { %245 = vmatpush.msra.mxu3 %v142_v31  ;;  %129 = vmatmul.f32.vlgmr.msra.gmra.mxu2 %v93_v32 }
  0x34   :  { %177 = vmatmul.f32.vlgmr.msra.gmra.mxu3 %v141_v33  ;;  %173 = vmatpush.msra.mxu1 %v142_v31 }
  0x35   :  { %126 = vmatmul.f32.vlgmr.msra.gmra.mxu0 %v92_v34  ;;  %174 = vmatmul.f32.vlgmr.msra.gmra.mxu1 %v140_v35 }
  0xb2   :  { %v127_v37 = vpop.f32.mrf.mxu0  ;;  %v175_v38 = vpop.f32.mrf.mxu1 }
  0xb3   :  { %v187_v39 = vadd.f32 %v253_v36, %v127_v37 }
  0xb5   :  { %v189_v40 = vadd.f32 %v187_v39, %v175_v38 }
  0xb6   :  { %v130_v41 = vpop.f32.mrf.mxu2 }
  0xb7   :  { %v178_v42 = vpop.f32.mrf.mxu3  ;;  %v188_v43 = vadd.f32 %v253_v36, %v130_v41  ;;  %191 = vst [vmem:[#allocation11] sm:$0xff] %v189_v40 }
  0xb9   :  { %v190_v44 = vadd.f32 %v188_v43, %v178_v42 }
  0xbb   :  { %192 = vst [vmem:[#allocation11 + $0x8] sm:$0xff] %v190_v44 }
  0xbc   :  { %205 = dma.vmem_to_hbm [thread:$0]  %s198_s14, 256, %s200_s17, [#allocation5], %s383_s26, %s383_s26, %s384_s27  }
  0xbd   :  { %380 = dma.done.wait [#allocation5], 256  }
  0xbe   :  { %381 = vsyncadd [#allocation5], 4294967040 }
  0xbf   :  { %210 = vsyncpa [#allocation4], 1 }
  0xc0   :  { %211 = vsyncpa [#allocation7], 1 }
  0xc1   :  { %212 = vsyncpa [#allocation10], 1 }
  0xc2   :  { %213 = vsyncpa [#allocation5], 1 }

</bundles_post_ra>
